<compile_context>
chip_gen: v7x
topology: tpu7x:2x2x1
jax: 0.10.0
libtpu: 0.0.40
codegen_flags: <defaults>
</compile_context>

<pallas_src>
import functools

import jax
import jax.numpy as jnp
from jax.experimental import pallas as pl
from jax.experimental.pallas import tpu as pltpu

IGNORE_INDEX = 1


def _ce_kernel(tgt_ref, logits_ref, sum_ref, cnt_ref,
               m_sc, l_sc, sel_sc, acc_sum, acc_cnt,
               *, vocab_size, vocab_chunk, need_vmask):
    j = pl.program_id(1)            # token tile within this core chunk
    k = pl.program_id(2)            # vocab chunk
    nj = pl.num_programs(1)
    nk = pl.num_programs(2)

    # Per-core-chunk accumulators: reset at the very first step of the chunk.
    @pl.when(jnp.logical_and(j == 0, k == 0))
    def _():
        acc_sum[...] = jnp.zeros_like(acc_sum)
        acc_cnt[...] = jnp.zeros_like(acc_cnt)

    # Per-token-tile running softmax stats: reset at the first vocab chunk.
    @pl.when(k == 0)
    def _():
        m_sc[...] = jnp.full_like(m_sc, -jnp.inf)
        l_sc[...] = jnp.zeros_like(l_sc)
        sel_sc[...] = jnp.zeros_like(sel_sc)

    x = logits_ref[...]                       # (tile, vc), native dtype (bf16/f32)
    tgt = tgt_ref[...]                        # (tile, 1) int32

    base = k * vocab_chunk                    # scalar offset of this vocab chunk
    # Local lane iota; comparisons use chunk-shifted scalars so we never add a
    # per-element offset.  (Iota is regenerated per step; caching it in VMEM
    # would cost tile*vc*4 B, not worth it.)
    lane = jax.lax.broadcasted_iota(jnp.int32, x.shape, 1)

    if need_vmask:
        # Mask out-of-vocab lanes of the (partial) tail chunk so they feed
        # neither the max nor sum(exp(.)).  exp(-inf - m) == 0.
        x = jnp.where(lane < vocab_size - base, x, jnp.asarray(-jnp.inf, dtype=x.dtype))

    # Online log-sum-exp: max runs on the raw dtype (exact for bf16); running
    # stats are f32; the f32 upcast of x is fused into the subtraction.
    m_prev = m_sc[...]
    m_new = jnp.maximum(m_prev,
                        jnp.max(x, axis=-1, keepdims=True).astype(jnp.float32))
    e = jnp.exp(x.astype(jnp.float32) - m_new)
    l_sc[...] = jnp.exp(m_prev - m_new) * l_sc[...] + jnp.sum(e, axis=-1, keepdims=True)
    m_sc[...] = m_new

    # Unshifted target logit: exactly one chunk contains the target (tgt < V),
    # so the masked sum accumulates the exact value.  Select stays in the raw
    # dtype (bf16 VALU on v6e/v7x), only the (tile,1) result is upcast.
    tgt_local = tgt - base
    sel_sc[...] = sel_sc[...] + jnp.sum(
        jnp.where(lane == tgt_local, x, jnp.zeros_like(x)),
        axis=-1, keepdims=True).astype(jnp.float32)

    # Finalize this token tile after the last vocab chunk.
    @pl.when(k == nk - 1)
    def _():
        valid = tgt != IGNORE_INDEX
        # CE = logsumexp - x[tgt] = m + log(l) - sel ; ignored / padded rows
        # (including garbage out-of-bounds logit rows) are masked to 0 here.
        per_tok = jnp.log(l_sc[...]) + m_sc[...] - sel_sc[...]
        acc_sum[...] = acc_sum[...] + jnp.where(valid, per_tok, 0.0)
        acc_cnt[...] = acc_cnt[...] + valid.astype(jnp.float32)

    # Single cross-sublane reduce + (1,1) store per core chunk.
    @pl.when(jnp.logical_and(j == nj - 1, k == nk - 1))
    def _():
        sum_ref[...] = jnp.sum(acc_sum[...], keepdims=True)
        cnt_ref[...] = jnp.sum(acc_cnt[...], keepdims=True)


def _round_up(x, m):
    return (x + m - 1) // m * m


def _tpu_info():
    """(vmem_capacity_bytes, tensorcores_per_chip) with conservative fallbacks."""
    vmem_cap = 64 << 20          # smallest per-TC VMEM across v5e/v6e/v7x
    n_cores = 1
    try:
        info = pltpu.get_tpu_info()
        vmem_cap = int(getattr(info, "vmem_capacity_bytes", vmem_cap))
        for name in ("num_tensorcores", "tensorcores_per_chip",
                     "num_cores", "core_count"):
            val = getattr(info, name, None)
            if val:
                n_cores = int(val)
                break
    except Exception:
        pass
    return vmem_cap, n_cores


def set_caption_criterion(pred_logits, caption_gt, *,
                          num_parallel=None, force_vocab_chunk=None):
    """loss_ce == F.cross_entropy(pred_logits.permute(0,2,1), caption_gt, ignore_index=1).

    pred_logits: [B, T, V] float (bf16 recommended: halves HBM traffic).
    caption_gt : [B, T] int.
    force_vocab_chunk: testing hook to exercise the vocab-chunked path.
    """
    B, T, V = pred_logits.shape
    N = B * T
    itemsize = jnp.dtype(pred_logits.dtype).itemsize

    vmem_cap, n_cores = _tpu_info()
    # Generation-aware scoped-VMEM limit: ~56 MiB on v7x (64 MiB physical),
    # ~110 MiB on v5e/v6e (128 MiB physical); conservative when detection fails.
    vmem_limit = int(min(max(vmem_cap - (8 << 20), 32 << 20), 110 << 20))
    # Budget for the streamed logits block + its f32 intermediates; allowance
    # for the target double-buffer, scratch rows, outputs and Mosaic internals.
    main_budget = vmem_limit - (8 << 20)
    # Bytes/element: double-buffered logits + ~4x f32 per-element temporaries.
    per_elem = 2 * itemsize + 16

    P = n_cores if num_parallel is None else int(num_parallel)
    P = max(1, min(P, 2, pl.cdiv(N, 8)))           # only >1 on multi-TC chips

    rows_per_core = _round_up(pl.cdiv(N, P), 8)
    v_pad_lanes = _round_up(V, 128)

    if force_vocab_chunk is not None:
        v_chunk = min(max(128, _round_up(int(force_vocab_chunk), 128)), v_pad_lanes)
        token_tile = min(256, rows_per_core)
        single = v_chunk >= v_pad_lanes
    else:
        tile_single = (main_budget // (v_pad_lanes * per_elem)) // 8 * 8
        single = tile_single >= min(256, rows_per_core)
        if single:
            token_tile = min(tile_single, rows_per_core)
            v_chunk = v_pad_lanes
        else:
            token_tile = min(256, rows_per_core)
            v_chunk = (main_budget // (max(token_tile, 8) * per_elem)) // 128 * 128
            v_chunk = int(min(max(v_chunk, 512), v_pad_lanes))

    token_tile = max(8, int(token_tile) // 8 * 8)

    if single:
        # One vocab chunk whose block covers the full (possibly ragged) vocab
        # dim -> the compiler masks the padded lanes itself; no in-kernel mask.
        v_chunk_block = V
        num_vc = 1
        need_vmask = False
    else:
        v_chunk_block = int(v_chunk)
        num_vc = -(-V // v_chunk_block)
        need_vmask = (num_vc * v_chunk_block != V)

    n_pad = _round_up(N, P * token_tile)
    num_inner = n_pad // (P * token_tile)
    # Clamp the logits block index so no block starts past the real token rows
    # (padded-row targets are ignore_index, so which rows get loaded for them
    # is irrelevant).
    max_logit_block = max(0, (N - 1) // token_tile)

    logits_flat = pred_logits.reshape(N, V)          # NOT padded: no extra HBM pass
    tgt_flat = caption_gt.reshape(N, 1).astype(jnp.int32)
    if n_pad != N:
        # Only the tiny target array is padded; padded rows use ignore_index so
        # they contribute to neither the loss sum nor the valid count.
        tgt_flat = jnp.pad(tgt_flat, ((0, n_pad - N), (0, 0)),
                           constant_values=IGNORE_INDEX)

    kernel = functools.partial(_ce_kernel, vocab_size=V,
                               vocab_chunk=v_chunk_block, need_vmask=need_vmask)

    sums, cnts = pl.pallas_call(
        kernel,
        out_shape=(jax.ShapeDtypeStruct((P, 1), jnp.float32),
                   jax.ShapeDtypeStruct((P, 1), jnp.float32)),
        grid_spec=pltpu.PrefetchScalarGridSpec(
            num_scalar_prefetch=0,
            grid=(P, num_inner, num_vc),
            in_specs=[
                # Targets streamed per token tile (constant across the vocab
                # axis, so fetched once per tile).
                pl.BlockSpec((token_tile, 1),
                             lambda p, j, k, _J=num_inner: (p * _J + j, 0)),
                # Logits streamed (double-buffered) over token and vocab tiles.
                pl.BlockSpec((token_tile, v_chunk_block),
                             lambda p, j, k, _J=num_inner, _M=max_logit_block:
                                 (jnp.minimum(p * _J + j, _M), k)),
            ],
            out_specs=(pl.BlockSpec((1, 1), lambda p, j, k: (p, 0)),
                       pl.BlockSpec((1, 1), lambda p, j, k: (p, 0))),
            scratch_shapes=[pltpu.VMEM((token_tile, 1), jnp.float32)
                            for _ in range(5)],   # m, l, sel, acc_sum, acc_cnt
        ),
        compiler_params=pltpu.CompilerParams(
            dimension_semantics=("parallel", "arbitrary", "arbitrary"),
            vmem_limit_bytes=vmem_limit,
        ),
    )(tgt_flat, logits_flat)

    # Mean over non-ignored tokens (matches reduction='mean', ignore_index=1;
    # yields NaN if every token is ignored, same as torch).
    return (jnp.sum(sums) / jnp.sum(cnts)).astype(jnp.float32)


def set_caption_criterion_forward(outputs, targets=None, positive_map=None):
    """Mirror of SetCaptionCriterion.forward: returns {'loss_ce': scalar}."""
    del targets, positive_map
    return {"loss_ce": set_caption_criterion(outputs["pred_logits"],
                                             outputs["caption_gt"])}


def _reference_loss(pred_logits, caption_gt):
    # Pure-JAX reference of F.cross_entropy(logits.permute(0,2,1), tgt, ignore_index=1)
    logp = jax.nn.log_softmax(pred_logits.astype(jnp.float32), axis=-1)   # [B,T,V]
    tgt = caption_gt.astype(jnp.int32)
    nll = -jnp.take_along_axis(logp, tgt[..., None], axis=-1)[..., 0]     # [B,T]
    valid = tgt != IGNORE_INDEX
    return jnp.sum(jnp.where(valid, nll, 0.0)) / jnp.sum(valid)


if __name__ == "__main__":
    key = jax.random.PRNGKey(0)
    k1, k2, k3, k4, k5, k6 = jax.random.split(key, 6)

    # Case 1: lane-aligned vocab, bf16 logits (recommended format).
    B, T, V = 2, 8, 128
    pred_logits = jax.random.normal(k1, (B, T, V), dtype=jnp.float32).astype(jnp.bfloat16)
    caption_gt = jax.random.randint(k2, (B, T), 0, V, dtype=jnp.int32)
    caption_gt = caption_gt.at[0, 0].set(1).at[1, 3].set(1)   # exercise ignore_index
    loss = jax.block_until_ready(set_caption_criterion(pred_logits, caption_gt))
    ref = jax.block_until_ready(_reference_loss(pred_logits, caption_gt))
    assert jnp.allclose(loss, ref, rtol=1e-5, atol=1e-5), (loss, ref)

    # Case 2: ragged vocab (block covers the full dim, no pad) and token count
    # that is not a multiple of the tile (targets row-padded with ignore_index).
    B2, T2, V2 = 2, 7, 100
    pred_logits2 = jax.random.normal(k3, (B2, T2, V2), dtype=jnp.float32)
    caption_gt2 = jax.random.randint(k4, (B2, T2), 0, V2, dtype=jnp.int32)
    caption_gt2 = caption_gt2.at[0, 2].set(1)
    loss2 = jax.block_until_ready(set_caption_criterion(pred_logits2, caption_gt2))
    ref2 = jax.block_until_ready(_reference_loss(pred_logits2, caption_gt2))
    assert jnp.allclose(loss2, ref2, rtol=1e-5, atol=1e-5), (loss2, ref2)

    # Case 3: force the vocab-chunked online-logsumexp path (incl. tail mask).
    B3, T3, V3 = 2, 9, 300
    pred_logits3 = jax.random.normal(k5, (B3, T3, V3), dtype=jnp.float32)
    caption_gt3 = jax.random.randint(k6, (B3, T3), 0, V3, dtype=jnp.int32)
    caption_gt3 = caption_gt3.at[1, 1].set(1)
    loss3 = jax.block_until_ready(
        set_caption_criterion(pred_logits3, caption_gt3, force_vocab_chunk=128))
    ref3 = jax.block_until_ready(_reference_loss(pred_logits3, caption_gt3))
    assert jnp.allclose(loss3, ref3, rtol=1e-5, atol=1e-5), (loss3, ref3)

    print("KERNEL_OK")
</pallas_src>

<mosaic_0001>
module attributes {stable_mosaic.version = 11 : i64} {
  func.func @_ce_kernel(%arg0: i32, %arg1: i32, %arg2: i32, %arg3: memref<16x1xi32, #tpu.memory_space<vmem>>, %arg4: memref<16x128xbf16, #tpu.memory_space<vmem>>, %arg5: memref<1x1xf32, #tpu.memory_space<vmem>>, %arg6: memref<1x1xf32, #tpu.memory_space<vmem>>, %arg7: memref<16x1xf32, #tpu.memory_space<vmem>>, %arg8: memref<16x1xf32, #tpu.memory_space<vmem>>, %arg9: memref<16x1xf32, #tpu.memory_space<vmem>>, %arg10: memref<16x1xf32, #tpu.memory_space<vmem>>, %arg11: memref<16x1xf32, #tpu.memory_space<vmem>>) attributes {dimension_semantics = [#tpu.dimension_semantics<parallel>, #tpu.dimension_semantics<arbitrary>, #tpu.dimension_semantics<arbitrary>], iteration_bounds = array<i64: 1, 1, 1>, scalar_prefetch = 0 : i64, scratch_operands = 5 : i64, tpu.core_type = #tpu.core_type<tc>, window_params = [{transform_indices = @transform_0, window_bounds = array<i64: 16, 1>}, {transform_indices = @transform_1, window_bounds = array<i64: 16, 128>}, {transform_indices = @transform_2, window_bounds = array<i64: 1, 1>}, {transform_indices = @transform_3, window_bounds = array<i64: 1, 1>}]} {
    %c0_i32 = arith.constant 0 : i32
    %0 = arith.cmpi eq, %arg1, %c0_i32 : i32
    %c0_i32_0 = arith.constant 0 : i32
    %1 = arith.cmpi eq, %arg2, %c0_i32_0 : i32
    %2 = arith.andi %0, %1 : i1
    %3 = arith.extui %2 : i1 to i32
    %c0_i32_1 = arith.constant 0 : i32
    %4 = arith.cmpi ne, %3, %c0_i32_1 : i32
    scf.if %4 {
      %cst_27 = arith.constant 0.000000e+00 : f32
      %52 = vector.broadcast %cst_27 : f32 to vector<16x1xf32>
      %c0_28 = arith.constant 0 : index
      %c0_29 = arith.constant 0 : index
      %53 = vector.load %arg10[%c0_28, %c0_29] : memref<16x1xf32, #tpu.memory_space<vmem>>, vector<16x1xf32>
      tpu.vector_store %arg10[%c0_28, %c0_29], %52 {strides = array<i32>} : memref<16x1xf32, #tpu.memory_space<vmem>>, vector<16x1xf32>,
      %cst_30 = arith.constant 0.000000e+00 : f32
      %54 = vector.broadcast %cst_30 : f32 to vector<16x1xf32>
      %c0_31 = arith.constant 0 : index
      %c0_32 = arith.constant 0 : index
      %55 = vector.load %arg11[%c0_31, %c0_32] : memref<16x1xf32, #tpu.memory_space<vmem>>, vector<16x1xf32>
      tpu.vector_store %arg11[%c0_31, %c0_32], %54 {strides = array<i32>} : memref<16x1xf32, #tpu.memory_space<vmem>>, vector<16x1xf32>,
    } else {
    }
    %c0_i32_2 = arith.constant 0 : i32
    %5 = arith.cmpi eq, %arg2, %c0_i32_2 : i32
    %6 = arith.extui %5 : i1 to i32
    %c0_i32_3 = arith.constant 0 : i32
    %7 = arith.cmpi ne, %6, %c0_i32_3 : i32
    scf.if %7 {
      %cst_27 = arith.constant 0xFF800000 : f32
      %52 = vector.broadcast %cst_27 : f32 to vector<16x1xf32>
      %c0_28 = arith.constant 0 : index
      %c0_29 = arith.constant 0 : index
      %53 = vector.load %arg7[%c0_28, %c0_29] : memref<16x1xf32, #tpu.memory_space<vmem>>, vector<16x1xf32>
      tpu.vector_store %arg7[%c0_28, %c0_29], %52 {strides = array<i32>} : memref<16x1xf32, #tpu.memory_space<vmem>>, vector<16x1xf32>,
      %cst_30 = arith.constant 0.000000e+00 : f32
      %54 = vector.broadcast %cst_30 : f32 to vector<16x1xf32>
      %c0_31 = arith.constant 0 : index
      %c0_32 = arith.constant 0 : index
      %55 = vector.load %arg8[%c0_31, %c0_32] : memref<16x1xf32, #tpu.memory_space<vmem>>, vector<16x1xf32>
      tpu.vector_store %arg8[%c0_31, %c0_32], %54 {strides = array<i32>} : memref<16x1xf32, #tpu.memory_space<vmem>>, vector<16x1xf32>,
      %cst_33 = arith.constant 0.000000e+00 : f32
      %56 = vector.broadcast %cst_33 : f32 to vector<16x1xf32>
      %c0_34 = arith.constant 0 : index
      %c0_35 = arith.constant 0 : index
      %57 = vector.load %arg9[%c0_34, %c0_35] : memref<16x1xf32, #tpu.memory_space<vmem>>, vector<16x1xf32>
      tpu.vector_store %arg9[%c0_34, %c0_35], %56 {strides = array<i32>} : memref<16x1xf32, #tpu.memory_space<vmem>>, vector<16x1xf32>,
    } else {
    }
    %c0 = arith.constant 0 : index
    %c0_4 = arith.constant 0 : index
    %8 = vector.load %arg4[%c0, %c0_4] : memref<16x128xbf16, #tpu.memory_space<vmem>>, vector<16x128xbf16>
    %c0_5 = arith.constant 0 : index
    %c0_6 = arith.constant 0 : index
    %9 = vector.load %arg3[%c0_5, %c0_6] : memref<16x1xi32, #tpu.memory_space<vmem>>, vector<16x1xi32>
    %c128_i32 = arith.constant 128 : i32
    %10 = arith.muli %arg2, %c128_i32 : i32
    %11 = tpu.iota {dimensions = array<i32: 1>} : vector<16x128xi32>
    %c0_7 = arith.constant 0 : index
    %c0_8 = arith.constant 0 : index
    %12 = vector.load %arg7[%c0_7, %c0_8] : memref<16x1xf32, #tpu.memory_space<vmem>>, vector<16x1xf32>
    %cst = arith.constant dense<0xFF80> : vector<16xbf16>
    %13 = vector.multi_reduction <maximumf>, %8, %cst [1] : vector<16x128xbf16> to vector<16xbf16>
    %14 = vector.shape_cast %13 : vector<16xbf16> to vector<16x1xbf16>
    %15 = arith.extf %14 : vector<16x1xbf16> to vector<16x1xf32>
    %16 = arith.maximumf %12, %15 : vector<16x1xf32>
    %17 = arith.extf %8 : vector<16x128xbf16> to vector<16x128xf32>
    %18 = vector.broadcast %16 : vector<16x1xf32> to vector<16x128xf32>
    %19 = arith.subf %17, %18 : vector<16x128xf32>
    %20 = math.exp %19 : vector<16x128xf32>
    %21 = arith.subf %12, %16 : vector<16x1xf32>
    %22 = math.exp %21 : vector<16x1xf32>
    %c0_9 = arith.constant 0 : index
    %c0_10 = arith.constant 0 : index
    %23 = vector.load %arg8[%c0_9, %c0_10] : memref<16x1xf32, #tpu.memory_space<vmem>>, vector<16x1xf32>
    %24 = arith.mulf %22, %23 : vector<16x1xf32>
    %cst_11 = arith.constant dense<0.000000e+00> : vector<16xf32>
    %25 = vector.multi_reduction <add>, %20, %cst_11 [1] : vector<16x128xf32> to vector<16xf32>
    %26 = vector.shape_cast %25 : vector<16xf32> to vector<16x1xf32>
    %27 = arith.addf %24, %26 : vector<16x1xf32>
    %c0_12 = arith.constant 0 : index
    %c0_13 = arith.constant 0 : index
    %28 = vector.load %arg8[%c0_12, %c0_13] : memref<16x1xf32, #tpu.memory_space<vmem>>, vector<16x1xf32>
    tpu.vector_store %arg8[%c0_12, %c0_13], %27 {strides = array<i32>} : memref<16x1xf32, #tpu.memory_space<vmem>>, vector<16x1xf32>,
    %c0_14 = arith.constant 0 : index
    %c0_15 = arith.constant 0 : index
    %29 = vector.load %arg7[%c0_14, %c0_15] : memref<16x1xf32, #tpu.memory_space<vmem>>, vector<16x1xf32>
    tpu.vector_store %arg7[%c0_14, %c0_15], %16 {strides = array<i32>} : memref<16x1xf32, #tpu.memory_space<vmem>>, vector<16x1xf32>,
    %30 = vector.broadcast %10 : i32 to vector<16x1xi32>
    %31 = arith.subi %9, %30 : vector<16x1xi32>
    %c0_16 = arith.constant 0 : index
    %c0_17 = arith.constant 0 : index
    %32 = vector.load %arg9[%c0_16, %c0_17] : memref<16x1xf32, #tpu.memory_space<vmem>>, vector<16x1xf32>
    %33 = vector.broadcast %31 : vector<16x1xi32> to vector<16x128xi32>
    %34 = arith.cmpi eq, %11, %33 : vector<16x128xi32>
    %cst_18 = arith.constant 0.000000e+00 : bf16
    %35 = vector.broadcast %cst_18 : bf16 to vector<16x128xbf16>
    %36 = arith.select %34, %8, %35 : vector<16x128xi1>, vector<16x128xbf16>
    %37 = arith.extf %36 : vector<16x128xbf16> to vector<16x128xf32>
    %cst_19 = arith.constant dense<0.000000e+00> : vector<16xf32>
    %38 = vector.multi_reduction <add>, %37, %cst_19 [1] : vector<16x128xf32> to vector<16xf32>
    %39 = vector.shape_cast %38 : vector<16xf32> to vector<16x1xf32>
    %40 = arith.truncf %39 : vector<16x1xf32> to vector<16x1xbf16>
    %41 = arith.extf %40 : vector<16x1xbf16> to vector<16x1xf32>
    %42 = arith.addf %32, %41 : vector<16x1xf32>
    %c0_20 = arith.constant 0 : index
    %c0_21 = arith.constant 0 : index
    %43 = vector.load %arg9[%c0_20, %c0_21] : memref<16x1xf32, #tpu.memory_space<vmem>>, vector<16x1xf32>
    tpu.vector_store %arg9[%c0_20, %c0_21], %42 {strides = array<i32>} : memref<16x1xf32, #tpu.memory_space<vmem>>, vector<16x1xf32>,
    %c0_i32_22 = arith.constant 0 : i32
    %44 = arith.cmpi eq, %arg2, %c0_i32_22 : i32
    %45 = arith.extui %44 : i1 to i32
    %c0_i32_23 = arith.constant 0 : i32
    %46 = arith.cmpi ne, %45, %c0_i32_23 : i32
    scf.if %46 {
      %c1_i32 = arith.constant 1 : i32
      %52 = vector.broadcast %c1_i32 : i32 to vector<16x1xi32>
      %53 = arith.cmpi ne, %9, %52 : vector<16x1xi32>
      %c0_27 = arith.constant 0 : index
      %c0_28 = arith.constant 0 : index
      %54 = vector.load %arg8[%c0_27, %c0_28] : memref<16x1xf32, #tpu.memory_space<vmem>>, vector<16x1xf32>
      %55 = math.log %54 : vector<16x1xf32>
      %c0_29 = arith.constant 0 : index
      %c0_30 = arith.constant 0 : index
      %56 = vector.load %arg7[%c0_29, %c0_30] : memref<16x1xf32, #tpu.memory_space<vmem>>, vector<16x1xf32>
      %57 = arith.addf %55, %56 : vector<16x1xf32>
      %c0_31 = arith.constant 0 : index
      %c0_32 = arith.constant 0 : index
      %58 = vector.load %arg9[%c0_31, %c0_32] : memref<16x1xf32, #tpu.memory_space<vmem>>, vector<16x1xf32>
      %59 = arith.subf %57, %58 : vector<16x1xf32>
      %c0_33 = arith.constant 0 : index
      %c0_34 = arith.constant 0 : index
      %60 = vector.load %arg10[%c0_33, %c0_34] : memref<16x1xf32, #tpu.memory_space<vmem>>, vector<16x1xf32>
      %cst_35 = arith.constant 0.000000e+00 : f32
      %61 = vector.broadcast %cst_35 : f32 to vector<16x1xf32>
      %62 = arith.select %53, %59, %61 : vector<16x1xi1>, vector<16x1xf32>
      %63 = arith.addf %60, %62 : vector<16x1xf32>
      %c0_36 = arith.constant 0 : index
      %c0_37 = arith.constant 0 : index
      %64 = vector.load %arg10[%c0_36, %c0_37] : memref<16x1xf32, #tpu.memory_space<vmem>>, vector<16x1xf32>
      tpu.vector_store %arg10[%c0_36, %c0_37], %63 {strides = array<i32>} : memref<16x1xf32, #tpu.memory_space<vmem>>, vector<16x1xf32>,
      %c0_38 = arith.constant 0 : index
      %c0_39 = arith.constant 0 : index
      %65 = vector.load %arg11[%c0_38, %c0_39] : memref<16x1xf32, #tpu.memory_space<vmem>>, vector<16x1xf32>
      %66 = arith.extui %53 : vector<16x1xi1> to vector<16x1xi32>
      %67 = arith.sitofp %66 : vector<16x1xi32> to vector<16x1xf32>
      %68 = arith.addf %65, %67 : vector<16x1xf32>
      %c0_40 = arith.constant 0 : index
      %c0_41 = arith.constant 0 : index
      %69 = vector.load %arg11[%c0_40, %c0_41] : memref<16x1xf32, #tpu.memory_space<vmem>>, vector<16x1xf32>
      tpu.vector_store %arg11[%c0_40, %c0_41], %68 {strides = array<i32>} : memref<16x1xf32, #tpu.memory_space<vmem>>, vector<16x1xf32>,
    } else {
    }
    %c0_i32_24 = arith.constant 0 : i32
    %47 = arith.cmpi eq, %arg1, %c0_i32_24 : i32
    %c0_i32_25 = arith.constant 0 : i32
    %48 = arith.cmpi eq, %arg2, %c0_i32_25 : i32
    %49 = arith.andi %47, %48 : i1
    %50 = arith.extui %49 : i1 to i32
    %c0_i32_26 = arith.constant 0 : i32
    %51 = arith.cmpi ne, %50, %c0_i32_26 : i32
    scf.if %51 {
      %c0_27 = arith.constant 0 : index
      %c0_28 = arith.constant 0 : index
      %52 = vector.load %arg10[%c0_27, %c0_28] : memref<16x1xf32, #tpu.memory_space<vmem>>, vector<16x1xf32>
      %53 = vector.shape_cast %52 : vector<16x1xf32> to vector<1x16x1xf32>
      %cst_29 = arith.constant dense<0.000000e+00> : vector<1xf32>
      %54 = vector.multi_reduction <add>, %53, %cst_29 [1, 2] : vector<1x16x1xf32> to vector<1xf32>
      %55 = vector.shape_cast %54 : vector<1xf32> to vector<1x1x1xf32>
      %56 = vector.extract %55[0, 0, 0] : f32 from vector<1x1x1xf32>
      %57 = vector.broadcast %56 : f32 to vector<1x1xf32>
      %c0_30 = arith.constant 0 : index
      %c0_31 = arith.constant 0 : index
      %58 = vector.load %arg5[%c0_30, %c0_31] : memref<1x1xf32, #tpu.memory_space<vmem>>, vector<1x1xf32>
      tpu.vector_store %arg5[%c0_30, %c0_31], %57 {strides = array<i32>} : memref<1x1xf32, #tpu.memory_space<vmem>>, vector<1x1xf32>,
      %c0_32 = arith.constant 0 : index
      %c0_33 = arith.constant 0 : index
      %59 = vector.load %arg11[%c0_32, %c0_33] : memref<16x1xf32, #tpu.memory_space<vmem>>, vector<16x1xf32>
      %60 = vector.shape_cast %59 : vector<16x1xf32> to vector<1x16x1xf32>
      %cst_34 = arith.constant dense<0.000000e+00> : vector<1xf32>
      %61 = vector.multi_reduction <add>, %60, %cst_34 [1, 2] : vector<1x16x1xf32> to vector<1xf32>
      %62 = vector.shape_cast %61 : vector<1xf32> to vector<1x1x1xf32>
      %63 = vector.extract %62[0, 0, 0] : f32 from vector<1x1x1xf32>
      %64 = vector.broadcast %63 : f32 to vector<1x1xf32>
      %c0_35 = arith.constant 0 : index
      %c0_36 = arith.constant 0 : index
      %65 = vector.load %arg6[%c0_35, %c0_36] : memref<1x1xf32, #tpu.memory_space<vmem>>, vector<1x1xf32>
      tpu.vector_store %arg6[%c0_35, %c0_36], %64 {strides = array<i32>} : memref<1x1xf32, #tpu.memory_space<vmem>>, vector<1x1xf32>,
    } else {
    }
    return
  }
  func.func @transform_0(%arg0: i32, %arg1: i32, %arg2: i32) -> (i32, i32) {
    %c1_i32 = arith.constant 1 : i32
    %0 = arith.muli %arg0, %c1_i32 : i32
    %1 = arith.addi %0, %arg1 : i32
    %c0_i32 = arith.constant 0 : i32
    %c0_i32_0 = arith.constant 0 : i32
    return %1, %c0_i32 : i32, i32
  }
  func.func @transform_1(%arg0: i32, %arg1: i32, %arg2: i32) -> (i32, i32) {
    %c1_i32 = arith.constant 1 : i32
    %0 = arith.muli %arg0, %c1_i32 : i32
    %1 = arith.addi %0, %arg1 : i32
    %c0_i32 = arith.constant 0 : i32
    %2 = arith.minsi %1, %c0_i32 : i32
    %c0_i32_0 = arith.constant 0 : i32
    return %2, %arg2 : i32, i32
  }
  func.func @transform_2(%arg0: i32, %arg1: i32, %arg2: i32) -> (i32, i32) {
    %c0_i32 = arith.constant 0 : i32
    %c0_i32_0 = arith.constant 0 : i32
    return %arg0, %c0_i32 : i32, i32
  }
  func.func @transform_3(%arg0: i32, %arg1: i32, %arg2: i32) -> (i32, i32) {
    %c0_i32 = arith.constant 0 : i32
    %c0_i32_0 = arith.constant 0 : i32
    return %arg0, %c0_i32 : i32, i32
  }
}

</mosaic_0001>

<bundles_post_ra>
// kernel: tpu_custom_call.1
= control target key start
LH: loop header
LB: loop body
LE: loop exit
PB: predicated region body
PF: predicated region fallthrough
CT: control target
= control target key end

     0   :  { %9 = vsyncpa [#allocation8], 0  ;;  %s481_s0 = inlined_call_operand.vmem [shape: s32[16,1], index: 0, kind: input, shape index: {}]   ;;  %s482_s1 = inlined_call_operand.vmem [shape: bf16[16,128], index: 1, kind: input, shape index: {}]   ;;  %s483_s2 = inlined_call_operand.hbm [shape: f32[1,1], index: 2, kind: output, shape index: {0}]   ;;  %s484_s3 = inlined_call_operand.hbm [shape: f32[1,1], index: 3, kind: output, shape index: {1}]  }
   0x1   :  { %v396_v0 = vld [vmem:[%s482_s1] sm:$0xf]  ;;  %v401_v1 = vld [vmem:[%s482_s1 + $0x4] sm:$0xf] }
   0x2   :  { %10 = vsyncpa [#allocation10], 0  ;;  %v293_v2 = vcombine.low %v396_v0, %v401_v1  ;;  %vm76_vm0 = vcmask 7168   ;;  %v368_v3 = vmov -inf   ;;  %v369_v4 = vmov 0   ;;  %v418_v6 = vld [vmem:[%s481_s0] sm:$0xff] }
   0x3   :  { %85 = vst.msk [vmem:[#allocation2] sm:$0xff] %vm76_vm0, %v368_v3  ;;  %86 = vst.msk [vmem:[#allocation2 + $0x8] sm:$0xff] %vm76_vm0, %v368_v3  ;;  %306 = vset.pattern.permute.xlu1 %v369_v4  ;;  %305 = vset.pattern.permute.xlu0 %v369_v4  ;;  %v370_v5 = vmov 0.0   ;;  %v423_v7 = vld [vmem:[%s481_s0 + $0x8] sm:$0xff]  ;;  %vm184_vm1 = vcmp.ne.s32.totalorder %v418_v6, 1  ;;  %v112_v23 = vunpack.c.l.bf16 %v396_v0  ;;  %v113_v24 = vunpack.c.l.bf16 %v401_v1  ;;  %s371_s0 = smov [#allocation7]  }
   0x4   :  { %106 = vmax.xlane.bf16.xlu0 %v293_v2  ;;  %79 = vst.msk [vmem:[#allocation6] sm:$0xff] %vm76_vm0, %v370_v5  ;;  %77 = vst.msk [vmem:[#allocation5] sm:$0xff] %vm76_vm0, %v370_v5  ;;  %vm185_vm2 = vcmp.ne.s32.totalorder %v423_v7, 1  ;;  %v294_v8 = vsel %vm184_vm1, 1.0, %v370_v5  ;;  %v96_v30 = vlaneseq  ;;  %s259_s19 = sshll.u32 %s371_s0, 4  ;;  %vm235_vm7 = vcmask 0   ;;  %s260_s19 = int_to_ptr.vmem [resolvable:$true] %s259_s19 }
   0x5   :  { %78 = vst.msk [vmem:[#allocation5 + $0x8] sm:$0xff] %vm76_vm0, %v370_v5  ;;  %80 = vst.msk [vmem:[#allocation6 + $0x8] sm:$0xff] %vm76_vm0, %v370_v5  ;;  %v295_v9 = vsel %vm185_vm2, 1.0, %v370_v5  ;;  %s372_s21 = smov [#allocation9]   ;;  %s320_s23 = scalar_lea.vmem %s260_s19, 16 }
   0x6   :  { %87 = vst.msk [vmem:[#allocation3] sm:$0xff] %vm76_vm0, %v370_v5  ;;  %88 = vst.msk [vmem:[#allocation3 + $0x8] sm:$0xff] %vm76_vm0, %v370_v5  ;;  %v97_v33 = vand.u32 127, %v96_v30  ;;  %s269_s22 = sshll.u32 %s372_s21, 4  ;;  %p321_p0 = scmp.ne.s32.totalorder %s260_s19, %s320_s23  ;;  %s270_s22 = int_to_ptr.vmem [resolvable:$true] %s269_s22 }
   0x7   :  { %89 = vst.msk [vmem:[#allocation4] sm:$0xff] %vm76_vm0, %v370_v5  ;;  %90 = vst.msk [vmem:[#allocation4 + $0x8] sm:$0xff] %vm76_vm0, %v370_v5  ;;  %s324_s24 = scalar_lea.vmem %s260_s19, 32  ;;  %p325_p1 = scmp.lt.s32.totalorder %s260_s19, %s260_s19 }
   0x8   :  { %p326_p2 = scmp.lt.s32.totalorder %s324_s24, %s320_s23 }
   0xa   :  { %v98_v15 = vld [vmem:[#allocation2] sm:$0xff]  ;;  %v99_v16 = vld [vmem:[#allocation2 + $0x8] sm:$0xff]  ;;  %p327_p3 = por %p326_p2, %p325_p1 }
   0xb   :  { %v208_v10 = vld [vmem:[#allocation6] sm:$0xff] }
   0xc   :  { %v209_v11 = vld [vmem:[#allocation6 + $0x8] sm:$0xff]  ;;  %v214_v12 = vadd.f32 %v294_v8, %v208_v10  ;;  %v200_v10 = vld [vmem:[#allocation5] sm:$0xff]  ;;  %p328_p4 = pnand %p327_p3, %p321_p0 }
   0xd   :  { %v215_v13 = vadd.f32 %v295_v9, %v209_v11  ;;  %v136_v44 = vld [vmem:[#allocation3] sm:$0xff]  ;;  %v137_v48 = vld [vmem:[#allocation3 + $0x8] sm:$0xff] }
   0xe   :  { %216 = vst.msk [vmem:[#allocation6] sm:$0xff] %vm76_vm0, %v214_v12  ;;  %v154_v57 = vld [vmem:[#allocation4] sm:$0xff]  ;;  %v155_v58 = vld [vmem:[#allocation4 + $0x8] sm:$0xff] }
   0xf   :  { %217 = vst.msk [vmem:[#allocation6 + $0x8] sm:$0xff] %vm76_vm0, %v215_v13 }
  0x95   :  { %v107_v14 = vpop.xlane.xlu0 %106 }
  0x96   :  { %v108_v17 = vunpack.c.l.bf16 %v107_v14  ;;  %v109_v18 = vunpack.c.h.bf16 %v107_v14 }
  0x98   :  { %v110_v19 = vmax.f32 %v98_v15, %v108_v17  ;;  %v111_v20 = vmax.f32 %v99_v16, %v109_v18  ;;  %v201_v17 = vld [vmem:[#allocation5 + $0x8] sm:$0xff] }
  0x9a   :  { %v130_v21 = vsub.f32 %v98_v15, %v110_v19  ;;  %v131_v22 = vsub.f32 %v99_v16, %v111_v20  ;;  %149 = vst.msk [vmem:[#allocation2] sm:$0xff] %vm76_vm0, %v110_v19  ;;  %150 = vst.msk [vmem:[#allocation2 + $0x8] sm:$0xff] %vm76_vm0, %v111_v20  ;;  %121 = vperm.xlu1 %306, %v111_v20   ;;  %116 = vperm.xlu0 %305, %v110_v19  }
  0x9c   :  { %v132_v41 = vmul.f32 1.442695, %v130_v21  ;;  %v134_v42 = vmul.f32 1.442695, %v131_v22  ;;  %v237_v21 = vld [vmem:[#allocation6] sm:$0xff]  ;;  %v238_v22 = vld [vmem:[#allocation6 + $0x8] sm:$0xff] }
  0x9e   :  { %157 = vperm.xlu1 %306, %v418_v6  }
  0xa1   :  { %v192_v2 = vld [vmem:[#allocation2] sm:$0xff]  ;;  %v193_v11 = vld [vmem:[#allocation2 + $0x8] sm:$0xff] }
  0xa2   :  { %160 = vperm.xlu1 %306, %v423_v7  }
 0x119   :  { %v122_v25 = vpop.permute.xlu1 %121  ;;  %v117_v26 = vpop.permute.xlu0 %116 }
 0x11a   :  { %v124_v27 = vsub.f32 %v112_v23, %v117_v26  ;;  %v125_v28 = vsub.f32 %v113_v24, %v122_v25  ;;  %v239_v25 = vsel %vm76_vm0, %v237_v21, 0.0  ;;  %v240_v26 = vsel %vm76_vm0, %v238_v22, 0.0 }
 0x11c   :  { %v126_v29 = vmul.f32 1.442695, %v124_v27  ;;  %v128_v32 = vmul.f32 1.442695, %v125_v28  ;;  %v241_v28 = vadd.f32 %v240_v26, %v239_v25 }
 0x11d   :  { %v158_v31 = vpop.permute.xlu1 %157 }
 0x11e   :  { %308 = vpow2.f32 %v126_v29  ;;  %vm162_vm5 = vcmp.eq.s32.totalorder %v97_v33, %v158_v31 }
 0x11f   :  { %310 = vpow2.f32 %v128_v32  ;;  %vm164_vm6 = vmpackc.low %vm162_vm5, %vm162_vm5 }
 0x120   :  { %v166_v39 = vsel %vm164_vm6, %v396_v0, 0  ;;  %312 = vpow2.f32 %v132_v41 }
 0x121   :  { %v161_v34 = vpop.permute.xlu1 %160  ;;  %v168_v40 = vunpack.c.l.bf16 %v166_v39  ;;  %314 = vpow2.f32 %v134_v42 }
 0x122   :  { %vm163_vm3 = vcmp.eq.s32.totalorder %v97_v33, %v161_v34 }
 0x123   :  { %vm165_vm4 = vmpackc.low %vm163_vm3, %vm163_vm3 }
 0x124   :  { %v167_v35 = vsel %vm165_vm4, %v401_v1, 0 }
 0x125   :  { %v169_v36 = vunpack.c.l.bf16 %v167_v35 }
 0x127   :  { %172 = vadd.xlane.f32.xlu0 %v169_v36 }
 0x128   :  { %v309_v37 = vpop.eup %308 }
 0x129   :  { %140 = vadd.xlane.f32.xlu1 %v309_v37  ;;  %v311_v38 = vpop.eup %310 }
 0x12a   :  { %v313_v43 = vpop.eup %312 }
 0x12b   :  { %v138_v45 = vmul.f32 %v313_v43, %v136_v44  ;;  %v315_v46 = vpop.eup %314 }
 0x12c   :  { %v139_v50 = vmul.f32 %v315_v46, %v137_v48 }
 0x12d   :  { %142 = vadd.xlane.f32.xlu1 %v311_v38 }
 0x131   :  { %170 = vadd.xlane.f32.xlu1 %v168_v40 }
 0x1b4   :  { %v173_v53 = vpop.xlane.xlu0 %172 }
 0x1b6   :  { %v141_v47 = vpop.xlane.xlu1 %140 }
 0x1b7   :  { %v144_v49 = vadd.f32 %v141_v47, %v138_v45 }
 0x1b9   :  { %147 = vst.msk [vmem:[#allocation3] sm:$0xff] %vm76_vm0, %v144_v49 }
 0x1ba   :  { %v143_v51 = vpop.xlane.xlu1 %142 }
 0x1bb   :  { %v145_v52 = vadd.f32 %v143_v51, %v139_v50 }
 0x1bd   :  { %148 = vst.msk [vmem:[#allocation3 + $0x8] sm:$0xff] %vm76_vm0, %v145_v52 }
 0x1be   :  { %v171_v54 = vpop.xlane.xlu1 %170 }
 0x1bf   :  { %v174_v55 = vpack.c.bf16 %v173_v53, %v171_v54 }
 0x1c0   :  { %v186_v56 = vld [vmem:[#allocation3] sm:$0xff] }
 0x1c1   :  { %316 = vlog2.f32 %v186_v56  ;;  %v175_v59 = vunpack.c.l.bf16 %v174_v55  ;;  %v176_v60 = vunpack.c.h.bf16 %v174_v55 }
 0x1c3   :  { %v177_v61 = vadd.f32 %v175_v59, %v154_v57  ;;  %v178_v62 = vadd.f32 %v176_v60, %v155_v58 }
 0x1c4   :  { %v187_v63 = vld [vmem:[#allocation3 + $0x8] sm:$0xff] }
 0x1c5   :  { %318 = vlog2.f32 %v187_v63  ;;  %179 = vst.msk [vmem:[#allocation4] sm:$0xff] %vm76_vm0, %v177_v61  ;;  %180 = vst.msk [vmem:[#allocation4 + $0x8] sm:$0xff] %vm76_vm0, %v178_v62 }
 0x1cb   :  { %v317_v0 = vpop.eup %316 }
 0x1cc   :  { %v189_v1 = vmul.f32 0.6931472, %v317_v0  ;;  %v196_v5 = vld [vmem:[#allocation4] sm:$0xff]  ;;  %v197_v14 = vld [vmem:[#allocation4 + $0x8] sm:$0xff] }
 0x1ce   :  { %v194_v3 = vadd.f32 %v192_v2, %v189_v1 }
 0x1cf   :  { %v319_v4 = vpop.eup %318 }
 0x1d0   :  { %v191_v8 = vmul.f32 0.6931472, %v319_v4  ;;  %v198_v9 = vsub.f32 %v194_v3, %v196_v5 }
 0x1d2   :  { %v195_v12 = vadd.f32 %v193_v11, %v191_v8  ;;  %v202_v13 = vsel %vm184_vm1, %v198_v9, 0.0 }
 0x1d3   :  { %v204_v15 = vadd.f32 %v202_v13, %v200_v10 }
 0x1d4   :  { %v199_v16 = vsub.f32 %v195_v12, %v197_v14 }
 0x1d5   :  { %206 = vst.msk [vmem:[#allocation5] sm:$0xff] %vm76_vm0, %v204_v15 }
 0x1d6   :  { %v203_v18 = vsel %vm185_vm2, %v199_v16, 0.0 }
 0x1d7   :  { %v205_v19 = vadd.f32 %v203_v18, %v201_v17 }
 0x1d9   :  { %207 = vst.msk [vmem:[#allocation5 + $0x8] sm:$0xff] %vm76_vm0, %v205_v19 }
 0x1dc   :  { %v220_v20 = vld [vmem:[#allocation5] sm:$0xff] }
 0x1dd   :  { %v222_v24 = vsel %vm76_vm0, %v220_v20, 0.0 }
 0x1e0   :  { %v221_v23 = vld [vmem:[#allocation5 + $0x8] sm:$0xff] }
 0x1e1   :  { %v223_v6 = vsel %vm76_vm0, %v221_v23, 0.0 }
 0x1e2   :  { %v224_v27 = vadd.f32 %v223_v6, %v222_v24 }
 0x1e4   :  { %225 = vadd.xlane.f32.xlu1 %v224_v27 }
 0x1e8   :  { %242 = vadd.xlane.f32.xlu1 %v241_v28 }
 0x271   :  { %v226_v7 = vpop.xlane.xlu1 %225 }
 0x272   :  { %v227_v29 = vrot.slane %v226_v7, 4 }
 0x274   :  { %v228_v30 = vadd.f32 %v227_v29, %v226_v7 }
 0x275   :  { %v243_v31 = vpop.xlane.xlu1 %242 }
 0x276   :  { %v229_v32 = vrot.slane %v228_v30, 2  ;;  %v244_v33 = vrot.slane %v243_v31, 4 }
 0x278   :  { %v245_v34 = vadd.f32 %v244_v33, %v243_v31  ;;  %v230_v35 = vadd.f32 %v229_v32, %v228_v30 }
 0x27a   :  { %v246_v36 = vrot.slane %v245_v34, 2  ;;  %v231_v37 = vrot.slane %v230_v35, 1 }
 0x27c   :  { %v247_v38 = vadd.f32 %v246_v36, %v245_v34  ;;  %v232_v39 = vadd.f32 %v231_v37, %v230_v35 }
 0x27e   :  { %296 = vpush %v232_v39  ;;  %v248_v40 = vrot.slane %v247_v38, 1 }
 0x280   :  { %v249_v41 = vadd.f32 %v248_v40, %v247_v38 }
 0x282   :  { %298 = vpush %v249_v41 }
 0x2af   :  { %s297_s20 = spop %296 }
 0x2b0   :  { %v234_v42 = vstv %s297_s20 }
 0x2b1   :  { %236 = vst.msk [vmem:[#allocation7] sm:$0x1] %vm235_vm7, %v234_v42 }
 0x2b2   :  { %331 = shalt.err (!%p328_p4)
}
 0x2b3   :  { %s332_s27 = scalar_lea.hbm %s483_s2, 16 }
 0x2b4   :  { %p333_p5 = scmp.ne.s32.totalorder %s483_s2, %s332_s27  ;;  %p336_p6 = scmp.lt.u32.totalorder %s332_s27, %s483_s2 }
 0x2b6   :  { %p338_p7 = pnand %p336_p6, %p333_p5 }
 0x2b8   :  { %341 = shalt.err (!%p338_p7)
}
 0x2b9   :  { %262 = dma.vmem_to_hbm [thread:$0]  %s260_s19, 16, %s483_s2, [#allocation8]  }
 0x2ba   :  { %s299_s7 = spop %298  ;;  %s342_s8 = scalar_lea.vmem %s270_s22, 16 }
 0x2bb   :  { %v251_v43 = vstv %s299_s7  ;;  %p343_p8 = scmp.ne.s32.totalorder %s270_s22, %s342_s8  ;;  %s346_s9 = scalar_lea.vmem %s270_s22, 32 }
 0x2bc   :  { %252 = vst.msk [vmem:[#allocation9] sm:$0x1] %vm235_vm7, %v251_v43  ;;  %p347_p9 = scmp.lt.s32.totalorder %s270_s22, %s270_s22  ;;  %p348_p10 = scmp.lt.s32.totalorder %s346_s9, %s342_s8 }
 0x2be   :  { %p349_p11 = por %p348_p10, %p347_p9 }
 0x2c0   :  { %p350_p12 = pnand %p349_p11, %p343_p8 }
 0x2c2   :  { %353 = shalt.err (!%p350_p12)
}
 0x2c3   :  { %s354_s12 = scalar_lea.hbm %s484_s3, 16 }
 0x2c4   :  { %p355_p13 = scmp.ne.s32.totalorder %s484_s3, %s354_s12  ;;  %p358_p0 = scmp.lt.u32.totalorder %s354_s12, %s484_s3 }
 0x2c6   :  { %p360_p1 = pnand %p358_p0, %p355_p13 }
 0x2c8   :  { %363 = shalt.err (!%p360_p1)
}
 0x2c9   :  { %272 = dma.vmem_to_hbm [thread:$0]  %s270_s22, 16, %s484_s3, [#allocation10]  }
 0x2ca   :  { %364 = dma.done.wait [#allocation8], 16  }
 0x2cb   :  { %365 = vsyncadd [#allocation8], 4294967280 }
 0x2cc   :  { %366 = dma.done.wait [#allocation10], 16  }
 0x2cd   :  { %367 = vsyncadd [#allocation10], 4294967280 }
 0x2ce   :  { %279 = vsyncpa [#allocation8], 1 }
 0x2cf   :  { %280 = vsyncpa [#allocation10], 1 }

</bundles_post_ra>
